<compile_context>
chip_gen: v7x
topology: tpu7x:2x2x1
jax: 0.10.0
libtpu: 0.0.40
codegen_flags: <defaults>
</compile_context>

<pallas_src>
import functools

import jax
import jax.numpy as jnp
from jax.experimental import pallas as pl
from jax.experimental.pallas import tpu as pltpu

LANE = 128


def _round_up(x, m):
    return ((x + m - 1) // m) * m


# ----------------------------------------------------------------------------
# Fused kernel: all GIN layers, noise concat, bias add and final ReLU.
# ----------------------------------------------------------------------------
def _noisy_gnn_kernel(*refs, num_layers, has_noise, project_first):
    """refs = (eps_gin [SMEM (L,)], A [N,N], X [N,Fx],
               noise_0..noise_{L-1}        (each [N, B*noise_dim], iff has_noise),
               W_comb_0, bias_0, ..., W_comb_{L-1}, bias_{L-1},
               out [N, B*Fout_p_last])"""
    eps_ref, a_ref, x_ref = refs[0], refs[1], refs[2]
    idx = 3
    noise_refs = ()
    if has_noise:
        noise_refs = refs[idx:idx + num_layers]
        idx += num_layers
    wb_refs = refs[idx:idx + 2 * num_layers]
    out_ref = refs[idx + 2 * num_layers]

    a = a_ref[...]                       # adjacency: loaded once, reused by all layers
    x = x_ref[...]                       # [N, Fx]: single copy shared by all B samples
    hidden = None                        # [N, B*Fout_prev], stays VMEM-resident between layers

    for l in range(num_layers):
        w = wb_refs[2 * l][...]          # [Fin_tot, B*Fout_p] combined block weight
        bias = wb_refs[2 * l + 1][...]   # [1, B*Fout_p] tiled, padded bias
        one_plus_eps = 1.0 + eps_ref[l]  # SMEM scalar, read once per layer

        if has_noise:
            pieces = [x, noise_refs[l][...]]
            if hidden is not None:
                pieces.append(hidden)
            inp = jnp.concatenate(pieces, axis=1)       # [N, Fin_tot], VMEM only
        else:
            inp = x if hidden is None else hidden

        if project_first[l]:
            # out = (1+e)*(inp @ W) + A @ (inp @ W) + b   (narrower aggregation width)
            h = jnp.dot(inp, w, preferred_element_type=jnp.float32)
            out = (one_plus_eps * h
                   + jnp.dot(a, h, preferred_element_type=jnp.float32) + bias)
        else:
            # out = ((1+e)*inp + A @ inp) @ W + b
            m = (one_plus_eps * inp
                 + jnp.dot(a, inp, preferred_element_type=jnp.float32))
            out = jnp.dot(m, w, preferred_element_type=jnp.float32) + bias

        if l == num_layers - 1:
            out_ref[...] = jnp.maximum(out, 0.0).astype(out_ref.dtype)   # F.relu
        else:
            hidden = out                 # pre-activation carry (matches the reference)


# ----------------------------------------------------------------------------
# Offline (parameter-only) preprocessing.
# ----------------------------------------------------------------------------
def _build_combined_weight(W, Fx, noise_dim, Fh, B, Fout_p, use_noise):
    """[in_feats, Fout] weight  ->  [Fin_tot, B*Fout_p] combined weight.

    Column block b reproduces `concat([X, eps_b, hidden_b]) @ W` for sample b:
      rows [0, Fx)                                   : W_x   (shared X, repeated per block)
      rows [Fx + b*nd, Fx + (b+1)*nd)                : W_eps (block diagonal)
      rows [Fx + B*nd + b*Fh, Fx + B*nd + (b+1)*Fh)  : W_hid (block diagonal)
    Output columns are zero-padded Fout -> Fout_p (sliced off after the call)."""
    Fout = W.shape[1]
    Wp = jnp.pad(W, ((0, 0), (0, Fout_p - Fout)))
    if not use_noise:
        return Wp
    nd = noise_dim
    W_x = Wp[:Fx]
    W_e = Wp[Fx:Fx + nd]
    W_h = Wp[Fx + nd:]                   # Fh rows (0 for the first layer)
    col_blocks = []
    for b in range(B):
        parts = [
            W_x,
            jnp.zeros((b * nd, Fout_p), Wp.dtype), W_e,
            jnp.zeros(((B - 1 - b) * nd, Fout_p), Wp.dtype),
            jnp.zeros((b * Fh, Fout_p), Wp.dtype), W_h,
            jnp.zeros(((B - 1 - b) * Fh, Fout_p), Wp.dtype),
        ]
        col_blocks.append(jnp.concatenate(parts, axis=0))
    return jnp.concatenate(col_blocks, axis=1)


def init_noisy_gnn_params(key, input_dim, output_dims, noise_dim):
    """Per-layer (W [in,out], bias [1,out], eps_gin (1,)) matching the torch init."""
    hidden_dims = [0] + list(output_dims)
    input_dims = [input_dim] + list(output_dims)
    params = []
    for i in range(len(output_dims)):
        if noise_dim != 0:
            in_feats = input_dim + noise_dim + hidden_dims[i]
            out_feats = hidden_dims[i + 1]
        else:
            in_feats = input_dims[i]
            out_feats = input_dims[i + 1]
        key, kw, kb = jax.random.split(key, 3)
        bound = 1.0 / jnp.sqrt(jnp.float32(in_feats))
        W = jax.random.uniform(kw, (in_feats, out_feats), jnp.float32,
                               minval=-bound, maxval=bound)
        bias = jax.random.uniform(kb, (1, out_feats), jnp.float32,
                                  minval=-bound, maxval=bound)
        eps = jnp.zeros((1,), jnp.float32)          # GINConv train_eps, init 0.0
        params.append((W, bias, eps))
    return params


# ----------------------------------------------------------------------------
# NoisyGNN forward (matches the PyTorch module's forward semantics).
# ----------------------------------------------------------------------------
def noisy_gnn_forward(A, X, params, noise_list, *, noise_dim, K, J, dropout=0.0):
    """A: [N,N] f32 dense adjacency, X: [1,N,Fx] f32.
    noise_list: per-layer noise, each [K+J, N, noise_dim] (ignored if noise_dim==0).
    Returns [K+J, N, output_dims[-1]] (or [1, N, ...] if noise_dim == 0)."""
    assert X.ndim == 3, "The input tensor dimension is not 3!"
    # dropout == 0 -> identity.
    # TODO(synk): dropout > 0 would need in-kernel pltpu.prng_* masking.
    del dropout

    N, Fx = X.shape[1], X.shape[2]
    x2d = X[0]                                   # un-broadcast: one shared copy in HBM/VMEM
    L = len(params)
    use_noise = noise_dim >= 1
    B = (K + J) if use_noise else 1

    eps_arr = jnp.stack([jnp.reshape(p[2], ()) for p in params]).astype(jnp.float32)

    # Parameter-only preprocessing (cacheable in a real training loop).
    w_combs, biases, noises, project_first = [], [], [], []
    Fh = 0
    Fout_last = params[-1][0].shape[1]
    Fout_p_last = _round_up(Fout_last, LANE)
    for l, (W, bias, _eps) in enumerate(params):
        Fout = W.shape[1]
        # Only the last layer's slab leaves VMEM, so only it is padded to a
        # lane-dense (multiple-of-128) width; intermediates keep real width.
        Fout_p = Fout_p_last if l == L - 1 else Fout
        Wc = _build_combined_weight(W, Fx, noise_dim, Fh, B, Fout_p, use_noise)
        bp = jnp.pad(jnp.reshape(bias, (1, Fout)), ((0, 0), (0, Fout_p - Fout)))
        w_combs.append(Wc)
        biases.append(jnp.tile(bp, (1, B)))
        # Aggregate-first iff the concat width is narrower than the projected
        # width (aggregate over the smaller feature dim).
        project_first.append(bool(B * Fout_p < Wc.shape[0]))
        if use_noise:
            eps_l = noise_list[l]                            # [B, N, nd] as torch samples it
            noises.append(jnp.transpose(eps_l, (1, 0, 2)).reshape(N, B * noise_dim))
        Fh = Fout                                            # next layer's per-sample hidden width

    wb_args = []
    for Wc, bt in zip(w_combs, biases):
        wb_args += [Wc, bt]
    # Kept in f32 to match the torch module's numerics.  (A is 0/1, so casting
    # A/activations/W to bf16 would be an exact-for-A further HBM/MXU saving.)
    args = [eps_arr, A.astype(jnp.float32), x2d, *noises, *wb_args]

    kernel = functools.partial(_noisy_gnn_kernel, num_layers=L,
                               has_noise=use_noise,
                               project_first=tuple(project_first))

    in_specs = ([pl.BlockSpec(memory_space=pltpu.MemorySpace.SMEM)] +
                [pl.BlockSpec(memory_space=pltpu.MemorySpace.VMEM)] * (len(args) - 1))

    # Everything (A, weights, activations) is VMEM resident at these sizes; a
    # grid-less call removes all per-step overhead and the hidden never
    # round-trips HBM.
    # TODO(synk): for large N (A ~ N^2 f32 beyond the scoped-VMEM limits, esp.
    # v7x's 64 MiB) switch to a (node_tile, sample) "parallel" grid with A
    # row-tiled via BlockSpec and raise vmem_limit_bytes in pltpu.CompilerParams.
    out_padded = pl.pallas_call(
        kernel,
        out_shape=jax.ShapeDtypeStruct((N, B * Fout_p_last), jnp.float32),
        in_specs=in_specs,
        out_specs=pl.BlockSpec(memory_space=pltpu.MemorySpace.VMEM),
    )(*args)

    # Wrapper-side layout plumbing: [N, B*Fout_p] -> [B, N, Fout].
    return out_padded.reshape(N, B, Fout_p_last).transpose(1, 0, 2)[:, :, :Fout_last]


# ----------------------------------------------------------------------------
# Plain-JAX replica of the torch forward (validation only).
# ----------------------------------------------------------------------------
def _reference_forward(A, X, params, noise_list, *, noise_dim, K, J):
    N = X.shape[1]
    use_noise = noise_dim >= 1
    B = (K + J) if use_noise else 1
    prec = jax.lax.Precision.HIGHEST
    hidden = None
    output = None
    for l, (W, bias, eps) in enumerate(params):
        if use_noise:
            Xe = jnp.broadcast_to(X, (B, N, X.shape[2]))
            pieces = [Xe, noise_list[l]]
            if hidden is not None:
                pieces.append(hidden)
            inp = jnp.concatenate(pieces, axis=2)
        else:
            inp = X if hidden is None else hidden
        agg = jnp.einsum('nm,bmf->bnf', A, inp, precision=prec)
        h = jnp.einsum('bnf,fo->bno', (1.0 + jnp.reshape(eps, ())) * inp + agg, W,
                       precision=prec)
        h = h + jnp.reshape(bias, (1, 1, -1))
        output = jnp.maximum(h, 0.0)      # activation computed every layer,
        hidden = h                        # but the carry is pre-activation
    return output                         # only the last activated output is returned


# ----------------------------------------------------------------------------
if __name__ == "__main__":
    # Small shapes consistent with the module.  output_dims chosen so the two
    # layers exercise both orderings (layer 1: aggregate-first, layer 2:
    # project-first).
    N = 16
    input_dim = 8
    output_dims = [128, 16]
    noise_dim = 4
    K, J = 2, 1
    B = K + J

    root = jax.random.PRNGKey(0)
    k_x, k_a, k_params, k_noise = jax.random.split(root, 4)

    X = jax.random.normal(k_x, (1, N, input_dim), dtype=jnp.float32)

    # Dense symmetric 0/1 adjacency, empty diagonal (stand-in for sparse COO A).
    A_rand = jax.random.uniform(k_a, (N, N))
    A = (A_rand < 0.3).astype(jnp.float32)
    A = jnp.maximum(A, A.T)
    A = A * (1.0 - jnp.eye(N, dtype=jnp.float32))

    params = init_noisy_gnn_params(k_params, input_dim, output_dims, noise_dim)

    # Pre-sampled per-layer noise (stands in for self.noise_dist.sample(...)).
    noise_list = []
    key = k_noise
    for _ in range(len(output_dims)):
        key, sub = jax.random.split(key)
        noise_list.append(jax.random.normal(sub, (B, N, noise_dim), dtype=jnp.float32))

    out = noisy_gnn_forward(A, X, params, noise_list,
                            noise_dim=noise_dim, K=K, J=J)
    out = jax.block_until_ready(out)

    assert out.shape == (B, N, output_dims[-1]), out.shape
    assert bool(jnp.all(out >= 0.0))               # final F.relu applied

    # Validate against the plain-JAX reference with identical params / noise.
    ref = _reference_forward(A, X, params, noise_list,
                             noise_dim=noise_dim, K=K, J=J)
    err = float(jnp.max(jnp.abs(out - ref)))
    scale = float(jnp.max(jnp.abs(ref))) + 1.0
    assert err <= 5e-2 * scale, (err, scale)
    print("KERNEL_OK")
</pallas_src>

<mosaic_0001>
module attributes {stable_mosaic.version = 11 : i64} {
  func.func @_noisy_gnn_kernel(%arg0: memref<2xf32, #tpu.memory_space<smem>>, %arg1: memref<16x16xf32, #tpu.memory_space<vmem>>, %arg2: memref<16x8xf32, #tpu.memory_space<vmem>>, %arg3: memref<16x12xf32, #tpu.memory_space<vmem>>, %arg4: memref<16x12xf32, #tpu.memory_space<vmem>>, %arg5: memref<20x384xf32, #tpu.memory_space<vmem>>, %arg6: memref<1x384xf32, #tpu.memory_space<vmem>>, %arg7: memref<404x384xf32, #tpu.memory_space<vmem>>, %arg8: memref<1x384xf32, #tpu.memory_space<vmem>>, %arg9: memref<16x384xf32, #tpu.memory_space<vmem>>) attributes {dimension_semantics = [], scalar_prefetch = 0 : i64, scratch_operands = 0 : i64, tpu.core_type = #tpu.core_type<tc>} {
    %c0 = arith.constant 0 : index
    %c0_0 = arith.constant 0 : index
    %0 = vector.load %arg1[%c0, %c0_0] : memref<16x16xf32, #tpu.memory_space<vmem>>, vector<16x16xf32>
    %c0_1 = arith.constant 0 : index
    %c0_2 = arith.constant 0 : index
    %1 = vector.load %arg2[%c0_1, %c0_2] : memref<16x8xf32, #tpu.memory_space<vmem>>, vector<16x8xf32>
    %c0_3 = arith.constant 0 : index
    %c0_4 = arith.constant 0 : index
    %2 = vector.load %arg5[%c0_3, %c0_4] : memref<20x384xf32, #tpu.memory_space<vmem>>, vector<20x384xf32>
    %c0_5 = arith.constant 0 : index
    %c0_6 = arith.constant 0 : index
    %3 = vector.load %arg6[%c0_5, %c0_6] : memref<1x384xf32, #tpu.memory_space<vmem>>, vector<1x384xf32>
    %c0_7 = arith.constant 0 : index
    %4 = memref.load %arg0[%c0_7] : memref<2xf32, #tpu.memory_space<smem>>
    %cst = arith.constant 1.000000e+00 : f32
    %5 = arith.addf %cst, %4 : f32
    %c0_8 = arith.constant 0 : index
    %c0_9 = arith.constant 0 : index
    %6 = vector.load %arg3[%c0_8, %c0_9] : memref<16x12xf32, #tpu.memory_space<vmem>>, vector<16x12xf32>
    %7 = tpu.concatenate %1, %6 in 1 : vector<16x8xf32>, vector<16x12xf32> -> vector<16x20xf32>
    %8 = vector.broadcast %5 : f32 to vector<16x20xf32>
    %9 = arith.mulf %8, %7 : vector<16x20xf32>
    %cst_10 = arith.constant dense<0.000000e+00> : vector<16x20xf32>
    %10 = tpu.matmul %0, %7, %cst_10 {dimension_numbers = #tpu.dot_dimension_numbers<[1], [0], [0], [1], [0, 0, 1, 1], [], []>} : vector<16x16xf32>, vector<16x20xf32>, vector<16x20xf32> -> vector<16x20xf32>
    %11 = arith.addf %9, %10 : vector<16x20xf32>
    %cst_11 = arith.constant dense<0.000000e+00> : vector<16x384xf32>
    %12 = tpu.matmul %11, %2, %cst_11 {dimension_numbers = #tpu.dot_dimension_numbers<[1], [0], [0], [1], [0, 0, 1, 1], [], []>} : vector<16x20xf32>, vector<20x384xf32>, vector<16x384xf32> -> vector<16x384xf32>
    %13 = vector.broadcast %3 : vector<1x384xf32> to vector<16x384xf32>
    %14 = arith.addf %12, %13 : vector<16x384xf32>
    %c0_12 = arith.constant 0 : index
    %c0_13 = arith.constant 0 : index
    %15 = vector.load %arg7[%c0_12, %c0_13] : memref<404x384xf32, #tpu.memory_space<vmem>>, vector<404x384xf32>
    %c0_14 = arith.constant 0 : index
    %c0_15 = arith.constant 0 : index
    %16 = vector.load %arg8[%c0_14, %c0_15] : memref<1x384xf32, #tpu.memory_space<vmem>>, vector<1x384xf32>
    %c1 = arith.constant 1 : index
    %17 = memref.load %arg0[%c1] : memref<2xf32, #tpu.memory_space<smem>>
    %cst_16 = arith.constant 1.000000e+00 : f32
    %18 = arith.addf %cst_16, %17 : f32
    %c0_17 = arith.constant 0 : index
    %c0_18 = arith.constant 0 : index
    %19 = vector.load %arg4[%c0_17, %c0_18] : memref<16x12xf32, #tpu.memory_space<vmem>>, vector<16x12xf32>
    %20 = tpu.concatenate %1, %19, %14 in 1 : vector<16x8xf32>, vector<16x12xf32>, vector<16x384xf32> -> vector<16x404xf32>
    %cst_19 = arith.constant dense<0.000000e+00> : vector<16x384xf32>
    %21 = tpu.matmul %20, %15, %cst_19 {dimension_numbers = #tpu.dot_dimension_numbers<[1], [0], [0], [1], [0, 0, 1, 1], [], []>} : vector<16x404xf32>, vector<404x384xf32>, vector<16x384xf32> -> vector<16x384xf32>
    %22 = vector.broadcast %18 : f32 to vector<16x384xf32>
    %23 = arith.mulf %22, %21 : vector<16x384xf32>
    %cst_20 = arith.constant dense<0.000000e+00> : vector<16x384xf32>
    %24 = tpu.matmul %0, %21, %cst_20 {dimension_numbers = #tpu.dot_dimension_numbers<[1], [0], [0], [1], [0, 0, 1, 1], [], []>} : vector<16x16xf32>, vector<16x384xf32>, vector<16x384xf32> -> vector<16x384xf32>
    %25 = arith.addf %23, %24 : vector<16x384xf32>
    %26 = vector.broadcast %16 : vector<1x384xf32> to vector<16x384xf32>
    %27 = arith.addf %25, %26 : vector<16x384xf32>
    %cst_21 = arith.constant 0.000000e+00 : f32
    %28 = vector.broadcast %cst_21 : f32 to vector<16x384xf32>
    %29 = arith.maximumf %27, %28 : vector<16x384xf32>
    %c0_22 = arith.constant 0 : index
    %c0_23 = arith.constant 0 : index
    %30 = vector.load %arg9[%c0_22, %c0_23] : memref<16x384xf32, #tpu.memory_space<vmem>>, vector<16x384xf32>
    tpu.vector_store %arg9[%c0_22, %c0_23], %29 {strides = array<i32>} : memref<16x384xf32, #tpu.memory_space<vmem>>, vector<16x384xf32>,
    return
  }
}

</mosaic_0001>

<bundles_post_ra>
// kernel: tpu_custom_call.1
= control target key start
LH: loop header
LB: loop body
LE: loop exit
PB: predicated region body
PF: predicated region fallthrough
CT: control target
= control target key end

     0   :  { %14 = vsyncpa [#allocation5], 0  ;;  %s1786_s0 = inlined_call_operand.hbm [shape: f32[2], index: 0, kind: input, shape index: {}]   ;;  %s1787_s1 = inlined_call_operand.vmem [shape: f32[16,16], index: 1, kind: input, shape index: {}]   ;;  %s1788_s2 = inlined_call_operand.vmem [shape: f32[16,8], index: 2, kind: input, shape index: {}]   ;;  %s1789_s3 = inlined_call_operand.vmem [shape: f32[16,12], index: 3, kind: input, shape index: {}]   ;;  %s1790_s4 = inlined_call_operand.hbm [shape: f32[16,12], index: 4, kind: input, shape index: {}]   ;;  %s1791_s5 = inlined_call_operand.hbm [shape: f32[20,384], index: 5, kind: input, shape index: {}]   ;;  %s1792_s6 = inlined_call_operand.vmem [shape: f32[1,384], index: 6, kind: input, shape index: {}]   ;;  %s1793_s7 = inlined_call_operand.hbm [shape: f32[404,384], index: 7, kind: input, shape index: {}]   ;;  %s1794_s8 = inlined_call_operand.vmem [shape: f32[1,384], index: 8, kind: input, shape index: {}]   ;;  %s1795_s9 = inlined_call_operand.hbm [shape: f32[16,384], index: 9, kind: output, shape index: {}]  }
   0x1   :  { %15 = vsyncpa [#allocation3], 0 }
   0x2   :  { %16 = vsyncpa [#allocation8], 0 }
   0x3   :  { %17 = vsyncpa [#allocation4], 0  ;;  %s1525_s30 = smov [#allocation7]   ;;  %s1419_s13 = scalar_lea.hbm %s1791_s5, 1152 }
   0x4   :  { %s49_s10 = sshll.u32 %s1525_s30, 4  ;;  %p1420_p0 = scmp.ne.s32.totalorder %s1791_s5, %s1419_s13  ;;  %s50_s10 = int_to_ptr.vmem [resolvable:$true] %s49_s10 }
   0x5   :  { %p1423_p1 = scmp.lt.u32.totalorder %s1419_s13, %s1791_s5 }
   0x7   :  { %p1425_p2 = pnand %p1423_p1, %p1420_p0 }
   0x9   :  { %1428 = shalt.err (!%p1425_p2)
}
   0xa   :  { %s1429_s18 = scalar_lea.vmem %s50_s10, 1152  ;;  %p1434_p4 = scmp.lt.s32.totalorder %s50_s10, %s50_s10 }
   0xb   :  { %p1430_p3 = scmp.ne.s32.totalorder %s50_s10, %s1429_s18  ;;  %p1435_p5 = scmp.lt.s32.totalorder %s1429_s18, %s1429_s18 }
   0xd   :  { %p1436_p6 = por %p1435_p5, %p1434_p4 }
   0xf   :  { %p1437_p7 = pnand %p1436_p6, %p1430_p3 }
  0x11   :  { %1440 = shalt.err (!%p1437_p7)
}
  0x12   :  { %s1526_s19 = smov 384   ;;  %s1527_s20 = smov 24  }
  0x13   :  { %55 = dma.hbm_to_vmem [thread:$0]  %s1791_s5, 1152, %s50_s10, [#allocation8], %s1526_s19, %s1526_s19, %s1527_s20  }
  0x14   :  { %s1441_s25 = scalar_lea.hbm %s1786_s0, 16 }
  0x15   :  { %p1442_p8 = scmp.ne.s32.totalorder %s1786_s0, %s1441_s25  ;;  %p1445_p9 = scmp.lt.u32.totalorder %s1441_s25, %s1786_s0 }
  0x17   :  { %p1447_p10 = pnand %p1445_p9, %p1442_p8 }
  0x19   :  { %1450 = shalt.err (!%p1447_p10)
}
  0x1a   :  { %s1528_s30 = smov [#allocation2]   ;;  %s1529_s5 = smov [#allocation6]  }
  0x1b   :  { %25 = dma.hbm_to_smem %s1786_s0, 16, %s1528_s30, [#allocation5]  }
  0x1c   :  { %s37_s10 = sshll.u32 %s1529_s5, 4  ;;  %s1451_s15 = scalar_lea.hbm %s1790_s4, 256  ;;  %s38_s10 = int_to_ptr.vmem [resolvable:$true] %s37_s10 }
  0x1d   :  { %p1452_p11 = scmp.ne.s32.totalorder %s1790_s4, %s1451_s15  ;;  %p1455_p12 = scmp.lt.u32.totalorder %s1451_s15, %s1790_s4 }
  0x1f   :  { %p1457_p13 = pnand %p1455_p12, %p1452_p11 }
  0x21   :  { %1460 = shalt.err (!%p1457_p13)
}
  0x22   :  { %s1461_s22 = scalar_lea.vmem %s38_s10, 256  ;;  %p1466_p1 = scmp.lt.s32.totalorder %s38_s10, %s38_s10 }
  0x23   :  { %p1462_p0 = scmp.ne.s32.totalorder %s38_s10, %s1461_s22  ;;  %p1467_p2 = scmp.lt.s32.totalorder %s1461_s22, %s1461_s22 }
  0x25   :  { %p1468_p3 = por %p1467_p2, %p1466_p1 }
  0x27   :  { %p1469_p4 = pnand %p1468_p3, %p1462_p0 }
  0x29   :  { %1472 = shalt.err (!%p1469_p4)
}
  0x2a   :  { %s1530_s0 = smov 128   ;;  %s1531_s23 = smov 8  }
  0x2b   :  { %43 = dma.hbm_to_vmem [thread:$0]  %s1790_s4, 256, %s38_s10, [#allocation3], %s1530_s0, %s1530_s0, %s1531_s23  }
  0x2c   :  { %s1532_s26 = smov [#allocation9]   ;;  %s1473_s30 = scalar_lea.hbm %s1793_s7, 19584 }
  0x2d   :  { %s63_s27 = sshll.u32 %s1532_s26, 4  ;;  %p1474_p5 = scmp.ne.s32.totalorder %s1793_s7, %s1473_s30  ;;  %s64_s27 = int_to_ptr.vmem [resolvable:$true] %s63_s27 }
  0x2e   :  { %p1477_p6 = scmp.lt.u32.totalorder %s1473_s30, %s1793_s7 }
  0x30   :  { %p1479_p7 = pnand %p1477_p6, %p1474_p5 }
  0x32   :  { %1482 = shalt.err (!%p1479_p7)
}
  0x33   :  { %s1483_s14 = scalar_lea.vmem %s64_s27, 19584  ;;  %p1488_p9 = scmp.lt.s32.totalorder %s64_s27, %s64_s27 }
  0x34   :  { %p1484_p8 = scmp.ne.s32.totalorder %s64_s27, %s1483_s14  ;;  %p1489_p10 = scmp.lt.s32.totalorder %s1483_s14, %s1483_s14 }
  0x36   :  { %p1490_p11 = por %p1489_p10, %p1488_p9 }
  0x38   :  { %p1491_p12 = pnand %p1490_p11, %p1484_p8 }
  0x3a   :  { %1494 = shalt.err (!%p1491_p12)
}
  0x3b   :  { %69 = dma.hbm_to_vmem [thread:$0]  %s1793_s7, 19584, %s64_s27, [#allocation8], %s1526_s19, %s1526_s19, %s1527_s20  }
  0x3c   :  { %1517 = dma.done.wait [#allocation5], 16  }
  0x3d   :  { %1518 = vsyncadd [#allocation5], 4294967280 }
  0x3e   :  { %1519 = dma.done.wait [#allocation3], 256  }
  0x3f   :  { %1520 = vsyncadd [#allocation3], 4294967040 }
  0x40   :  { %1521 = dma.done.wait [#allocation8], 20736  }
  0x41   :  { %1522 = vsyncadd [#allocation8], 4294946560 }
  0x42   :  { %84 = sfence }
  0x43   :  { %v101_v0 = vld [vmem:[%s1789_s3] sm:$0xff]  ;;  %vm117_vm0 = vcmask 130048   ;;  %v102_v2 = vld [vmem:[%s1789_s3 + $0x8] sm:$0xff]  ;;  %vm111_vm1 = vcmask 64512   ;;  %v90_v6 = vld [vmem:[#allocation7 + $0x8] sm:$0xff]  ;;  %vm224_vm2 = vcmask 1043456  }
  0x44   :  { %105 = vrot.lane.b32.xlu0 %v101_v0, %s1531_s23  ;;  %v1649_v1 = vld [vmem:[%s1787_s1] sm:$0xff]  ;;  %v1665_v5 = vld [vmem:[%s1788_s2 + $0x8] sm:$0xff]  ;;  %v93_v7 = vld [vmem:[#allocation7 + $0x20] sm:$0xff]  ;;  %v1533_v19 = vmov 0.0   ;;  %vm217_vm3 = vcmask 162816   ;;  %s1128_s28 = sld [smem:[#allocation2 + $0x1]] }
  0x45   :  { %1195 = vmatprep.mubr.msk.f32.mxu0 %vm117_vm0, %v1649_v1  ;;  %v1660_v4 = vld [vmem:[%s1788_s2] sm:$0xff]  ;;  %v1218_v12 = vpack.c.bf16 %v93_v7, %v90_v6  ;;  %v89_v13 = vld [vmem:[#allocation7] sm:$0xff]  ;;  %v92_v14 = vld [vmem:[#allocation7 + $0x18] sm:$0xff] }
  0x46   :  { %v1674_v15 = vld [vmem:[%s1787_s1 + $0x8] sm:$0xff]  ;;  %v1220_v16 = vpack.c.bf16 %v92_v14, %v89_v13  ;;  %v95_v18 = vld [vmem:[#allocation7 + $0x30] sm:$0xf]  ;;  %v94_v21 = vld [vmem:[#allocation7 + $0x28] sm:$0xff]  ;;  %s99_s1 = sld [smem:[#allocation2]] }
  0x47   :  { %v96_v17 = vld [vmem:[#allocation7 + $0x38] sm:$0xf]  ;;  %v91_v20 = vld [vmem:[#allocation7 + $0x10] sm:$0xff]  ;;  %v97_v30 = vld [vmem:[#allocation7 + $0x40] sm:$0xf] }
  0x48   :  { %107 = vrot.lane.b32.xlu0 %v102_v2, %s1531_s23  ;;  %v1222_v22 = vpack.c.bf16 %v94_v21, %v91_v20  ;;  %v542_v31 = vld [vmem:[#allocation6] sm:$0xff]  ;;  %v543_v32 = vld [vmem:[#allocation6 + $0x8] sm:$0xff]  ;;  %v390_v34 = vld [vmem:[#allocation9 + $0x20] sm:$0xff] }
  0x49   :  { %546 = vrot.lane.b32.xlu1 %v542_v31, %s1531_s23  ;;  %v387_v33 = vld [vmem:[#allocation9 + $0x8] sm:$0xff]  ;;  %v386_v35 = vld [vmem:[#allocation9] sm:$0xff]  ;;  %v389_v37 = vld [vmem:[#allocation9 + $0x18] sm:$0xff] }
  0x4a   :  { %v1226_v36 = vpack.c.bf16 %v390_v34, %v387_v33  ;;  %v393_v38 = vld [vmem:[#allocation9 + $0x38] sm:$0xff]  ;;  %v396_v39 = vld [vmem:[#allocation9 + $0x50] sm:$0xff]  ;;  %v1228_v40 = vpack.c.bf16 %v389_v37, %v386_v35  ;;  %v395_v43 = vld [vmem:[#allocation9 + $0x48] sm:$0xff]  ;;  %s541_s29 = sadd.f32 1.0, %s1128_s28 }
  0x4b   :  { %v1230_v41 = vpack.c.bf16 %v396_v39, %v393_v38  ;;  %v392_v42 = vld [vmem:[#allocation9 + $0x30] sm:$0xff]  ;;  %v399_v44 = vld [vmem:[#allocation9 + $0x68] sm:$0xff]  ;;  %v402_v45 = vld [vmem:[#allocation9 + $0x80] sm:$0xff] }
  0x4c   :  { %s100_s2 = sadd.f32 1.0, %s99_s1  ;;  %548 = vrot.lane.b32.xlu0 %v543_v32, %s1531_s23  ;;  %1227 = vmatprep.subr.bf16.mxu1 %v1226_v36  ;;  %v1232_v46 = vpack.c.bf16 %v395_v43, %v392_v42  ;;  %v1234_v47 = vpack.c.bf16 %v402_v45, %v399_v44  ;;  %v398_v48 = vld [vmem:[#allocation9 + $0x60] sm:$0xff]  ;;  %v401_v49 = vld [vmem:[#allocation9 + $0x78] sm:$0xff]  ;;  %v408_v51 = vld [vmem:[#allocation9 + $0xb0] sm:$0xff] }
  0x4d   :  { %1229 = vmatpush1.bf16.msra.mxu1 %v1228_v40  ;;  %v405_v50 = vld [vmem:[#allocation9 + $0x98] sm:$0xff]  ;;  %v1236_v52 = vpack.c.bf16 %v401_v49, %v398_v48  ;;  %v404_v54 = vld [vmem:[#allocation9 + $0x90] sm:$0xff]  ;;  %v407_v55 = vld [vmem:[#allocation9 + $0xa8] sm:$0xff] }
  0x4e   :  { %v114_v23 = vstv %s100_s2  ;;  %1231 = vmatprep.subr.bf16.mxu1 %v1230_v41  ;;  %v1238_v53 = vpack.c.bf16 %v408_v51, %v405_v50  ;;  %v411_v56 = vld [vmem:[#allocation9 + $0xc8] sm:$0xff]  ;;  %v414_v57 = vld [vmem:[#allocation9 + $0xe0] sm:$0xff]  ;;  %v436_v58 = vld [vmem:[#allocation9 + $0x190] sm:$0xff]  ;;  %v1240_v60 = vpack.c.bf16 %v407_v55, %v404_v54 }
  0x4f   :  { %v439_v59 = vld [vmem:[#allocation9 + $0x1a8] sm:$0xff]  ;;  %v410_v61 = vld [vmem:[#allocation9 + $0xc0] sm:$0xff]  ;;  %v388_v63 = vld [vmem:[#allocation9 + $0x10] sm:$0xff]  ;;  %v1242_v0 = vpack.c.bf16 %v414_v57, %v411_v56 }
  0x50   :  { %v1326_v62 = vpack.c.bf16 %v439_v59, %v436_v58  ;;  %v413_v2 = vld [vmem:[#allocation9 + $0xd8] sm:$0xff]  ;;  %v391_v6 = vld [vmem:[#allocation9 + $0x28] sm:$0xff]  ;;  %v420_v7 = vld [vmem:[#allocation9 + $0x110] sm:$0xff] }
  0x51   :  { %1233 = vmatpush1.bf16.msra.mxu1 %v1232_v46  ;;  %v397_v13 = vld [vmem:[#allocation9 + $0x58] sm:$0xff]  ;;  %v1244_v14 = vpack.c.bf16 %v413_v2, %v410_v61  ;;  %v419_v21 = vld [vmem:[#allocation9 + $0x108] sm:$0xff]  ;;  %v422_v31 = vld [vmem:[#allocation9 + $0x120] sm:$0xff] }
  0x52   :  { %1235 = vmatprep.subr.bf16.mxu1 %v1234_v47  ;;  %v425_v32 = vld [vmem:[#allocation9 + $0x138] sm:$0xff]  ;;  %v406_v37 = vld [vmem:[#allocation9 + $0xa0] sm:$0xff]  ;;  %v432_v39 = vld [vmem:[#allocation9 + $0x170] sm:$0xff] }
  0x53   :  { %v429_v35 = vld [vmem:[#allocation9 + $0x158] sm:$0xff]  ;;  %v460_v40 = vld [vmem:[#allocation9 + $0x250] sm:$0xff]  ;;  %v463_v41 = vld [vmem:[#allocation9 + $0x268] sm:$0xff]  ;;  %v1252_v42 = vpack.c.bf16 %v425_v32, %v422_v31 }
  0x54   :  { %v409_v38 = vld [vmem:[#allocation9 + $0xb8] sm:$0xff]  ;;  %v428_v43 = vld [vmem:[#allocation9 + $0x150] sm:$0xff]  ;;  %v431_v44 = vld [vmem:[#allocation9 + $0x168] sm:$0xff]  ;;  %v1254_v46 = vpack.c.bf16 %v432_v39, %v429_v35  ;;  %v1342_v48 = vpack.c.bf16 %v463_v41, %v460_v40 }
  0x55   :  { %1237 = vmatpush1.bf16.msra.mxu1 %v1236_v52  ;;  %v1340_v45 = vpack.c.bf16 %v409_v38, %v406_v37  ;;  %v435_v47 = vld [vmem:[#allocation9 + $0x188] sm:$0xff]  ;;  %v412_v49 = vld [vmem:[#allocation9 + $0xd0] sm:$0xff]  ;;  %v438_v51 = vld [vmem:[#allocation9 + $0x1a0] sm:$0xff]  ;;  %v1256_v54 = vpack.c.bf16 %v431_v44, %v428_v43 }
  0x56   :  { %1239 = vmatprep.subr.bf16.mxu1 %v1238_v53  ;;  %v415_v50 = vld [vmem:[#allocation9 + $0xe8] sm:$0xff]  ;;  %v466_v52 = vld [vmem:[#allocation9 + $0x280] sm:$0xff]  ;;  %v469_v53 = vld [vmem:[#allocation9 + $0x298] sm:$0xff]  ;;  %v1258_v58 = vpack.c.bf16 %v438_v51, %v435_v47 }
  0x57   :  { %v434_v55 = vld [vmem:[#allocation9 + $0x180] sm:$0xff]  ;;  %v437_v56 = vld [vmem:[#allocation9 + $0x198] sm:$0xff]  ;;  %v1344_v57 = vpack.c.bf16 %v415_v50, %v412_v49  ;;  %v475_v2 = vld [vmem:[#allocation9 + $0x2c8] sm:$0xff] }
  0x58   :  { %v441_v59 = vld [vmem:[#allocation9 + $0x1b8] sm:$0xff]  ;;  %v418_v61 = vld [vmem:[#allocation9 + $0x100] sm:$0xff]  ;;  %v459_v31 = vld [vmem:[#allocation9 + $0x248] sm:$0xff] }
  0x59   :  { %1241 = vmatpush1.bf16.msra.mxu1 %v1240_v60  ;;  %v1346_v60 = vpack.c.bf16 %v469_v53, %v466_v52  ;;  %v462_v32 = vld [vmem:[#allocation9 + $0x260] sm:$0xff]  ;;  %v465_v37 = vld [vmem:[#allocation9 + $0x278] sm:$0xff]  ;;  %v468_v38 = vld [vmem:[#allocation9 + $0x290] sm:$0xff]  ;;  %v202_v53 = vlaneseq }
  0x5a   :  { %1243 = vmatprep.subr.bf16.mxu1 %v1242_v0  ;;  %v472_v0 = vld [vmem:[#allocation9 + $0x2b0] sm:$0xff]  ;;  %v458_v35 = vld [vmem:[#allocation9 + $0x240] sm:$0xff]  ;;  %v1278_v40 = vpack.c.bf16 %v468_v38, %v465_v37  ;;  %v471_v43 = vld [vmem:[#allocation9 + $0x2a8] sm:$0xff] }
  0x5b   :  { %v464_v41 = vld [vmem:[#allocation9 + $0x270] sm:$0xff]  ;;  %v474_v44 = vld [vmem:[#allocation9 + $0x2c0] sm:$0xff]  ;;  %v477_v49 = vld [vmem:[#allocation9 + $0x2d8] sm:$0xff] }
  0x5c   :  { %v470_v47 = vld [vmem:[#allocation9 + $0x2a0] sm:$0xff]  ;;  %v480_v50 = vld [vmem:[#allocation9 + $0x2f0] sm:$0xff] }
  0x5d   :  { %1245 = vmatpush1.bf16.msra.mxu1 %v1244_v14  ;;  %v450_v14 = vld [vmem:[#allocation9 + $0x200] sm:$0xff]  ;;  %v1286_v52 = vpack.c.bf16 %v480_v50, %v477_v49 }
  0xb6   :  { %v106_v3 = vpop.permute.xlu0 %105 }
  0xb7   :  { %v112_v9 = vsel %vm111_vm1, %v1660_v4, %v106_v3  ;;  %v417_v3 = vld [vmem:[#allocation9 + $0xf8] sm:$0xff] }
  0xb8   :  { %v115_v26 = vmul.f32 %v114_v23, %v112_v9  ;;  %v1246_v20 = vpack.c.bf16 %v420_v7, %v417_v3  ;;  %v1260_v3 = vpack.c.bf16 %v437_v56, %v434_v55  ;;  %v443_v7 = vld [vmem:[#allocation9 + $0x1c8] sm:$0xff]  ;;  %v476_v55 = vld [vmem:[#allocation9 + $0x2d0] sm:$0xff] }
  0xb9   :  { %v479_v56 = vld [vmem:[#allocation9 + $0x2e8] sm:$0xff] }
  0xba   :  { %v108_v8 = vpop.permute.xlu0 %107  ;;  %1247 = vmatprep.subr.bf16.mxu1 %v1246_v20 }
  0xbb   :  { %v113_v10 = vsel %vm111_vm1, %v1665_v5, %v108_v8  ;;  %v1328_v8 = vpack.c.bf16 %v391_v6, %v388_v63  ;;  %v444_v63 = vld [vmem:[#allocation9 + $0x1d0] sm:$0xff] }
  0xbc   :  { %v1214_v11 = vpack.c.bf16 %v113_v10, %v112_v9  ;;  %v116_v24 = vmul.f32 %v114_v23, %v113_v10  ;;  %v442_v9 = vld [vmem:[#allocation9 + $0x1c0] sm:$0xff]  ;;  %v445_v10 = vld [vmem:[#allocation9 + $0x1d8] sm:$0xff]  ;;  %v451_v23 = vld [vmem:[#allocation9 + $0x208] sm:$0xff] }
  0xbd   :  { %v440_v6 = vld [vmem:[#allocation9 + $0x1b0] sm:$0xff] }
  0xbe   :  { %1215 = vmatprep.subr.bf16.mxu0 %v1214_v11 }
  0xbf   :  { %1217 = vmatpush3.bf16.msra.mxu0 %v1214_v11  ;;  %v1330_v11 = vpack.c.bf16 %v445_v10, %v442_v9  ;;  %v1262_v9 = vpack.c.bf16 %v444_v63, %v441_v59  ;;  %v447_v10 = vld [vmem:[#allocation9 + $0x1e8] sm:$0xff]  ;;  %v433_v59 = vld [vmem:[#allocation9 + $0x178] sm:$0xff]  ;;  %v486_v63 = vld [vmem:[#allocation9 + $0x320] sm:$0xff] }
  0xc0   :  { %1219 = vmatprep.subr.bf16.mxu0 %v1218_v12  ;;  %v394_v12 = vld [vmem:[#allocation9 + $0x40] sm:$0xff] }
  0xc2   :  { %1196 = vmatmul.mubr.msk.f32.vlgmr.msra.gmra.mrb[0].mxu0 %vm117_vm0, %v1674_v15 }
  0xc3   :  { %1221 = vmatpush1.bf16.msra.mxu0 %v1220_v16  ;;  %298 = vmatprep.mubr.f32.mxu0 %v1533_v19  ;;  %v416_v16 = vld [vmem:[#allocation9 + $0xf0] sm:$0xff] }
  0xc4   :  { %1121 = vmatprep.subr.msk.mxu0 %vm224_vm2, %v96_v17  ;;  %v1332_v17 = vpack.c.bf16 %v397_v13, %v394_v12  ;;  %v424_v12 = vld [vmem:[#allocation9 + $0x130] sm:$0xff]  ;;  %v427_v13 = vld [vmem:[#allocation9 + $0x148] sm:$0xff] }
  0xc5   :  { %v1352_v20 = vpack.c.bf16 %v427_v13, %v424_v12 }
  0xc7   :  { %1122 = vmatpush1.msk.msra.mxu0 %vm224_vm2, %v95_v18  ;;  %v448_v18 = vld [vmem:[#allocation9 + $0x1f0] sm:$0xff] }
  0xc8   :  { %1223 = vmatprep.subr.bf16.mxu0 %v1222_v22 }
 0x195   :  { %v1197_v25 = vpop.f32.mrb[0].mxu0 }
 0x196   :  { %v200_v27 = vadd.f32 %v1197_v25, %v116_v24  ;;  %v190_v28 = vpop.f32.mrb[1].mxu0  ;;  %v426_v24 = vld [vmem:[#allocation9 + $0x140] sm:$0xff]  ;;  %v1334_v25 = vpack.c.bf16 %v451_v23, %v448_v18  ;;  %v1264_v18 = vpack.c.bf16 %v443_v7, %v440_v6  ;;  %v449_v23 = vld [vmem:[#allocation9 + $0x1f8] sm:$0xff]  ;;  %v1534_v6 = vmov 0.0|0.0  }
 0x197   :  { %v199_v29 = vadd.f32 %v190_v28, %v115_v26  ;;  %v400_v26 = vld [vmem:[#allocation9 + $0x70] sm:$0xff]  ;;  %v454_v28 = vld [vmem:[#allocation9 + $0x220] sm:$0xff] }
 0x199   :  { %1123 = vmatmul.mubr.msk.f32.vlgmr.msra.gmra.mrb[2].mxu0 %vm217_vm3, %v199_v29 }
 0x19a   :  { %304 = vmatprep.mubr.f32.mxu0 %v1533_v19  ;;  %1225 = vmatpush3.bf16.msra.mxu0 %v1222_v22  ;;  %v423_v22 = vld [vmem:[#allocation9 + $0x128] sm:$0xff] }
 0x19b   :  { %1202 = vmatprep.subr.msk.mxu0 %vm224_vm2, %v97_v30  ;;  %v1250_v34 = vpack.c.bf16 %v426_v24, %v423_v22  ;;  %v446_v22 = vld [vmem:[#allocation9 + $0x1e0] sm:$0xff] }
 0x19d   :  { %1124 = vmatmul.mubr.msk.f32.gmra.mrb[4].mxu0 %vm217_vm3, %v200_v27 }
 0x19e   :  { %1204 = vmatprep.mubr.msk.f32.mxu0 %vm217_vm3, %v199_v29  ;;  %1203 = vmatpush3.msk.msra.mxu0 %vm224_vm2, %v97_v30  ;;  %v457_v29 = vld [vmem:[#allocation9 + $0x238] sm:$0xff]  ;;  %v1248_v30 = vpack.c.bf16 %v419_v21, %v416_v16  ;;  %v478_v16 = vld [vmem:[#allocation9 + $0x2e0] sm:$0xff]  ;;  %v1266_v21 = vpack.c.bf16 %v450_v14, %v447_v10 }
 0x19f   :  { %1327 = vmatprep.subr.bf16.mxu0 %v1326_v62  ;;  %v1338_v36 = vpack.c.bf16 %v457_v29, %v454_v28  ;;  %v421_v62 = vld [vmem:[#allocation9 + $0x118] sm:$0xff]  ;;  %v452_v29 = vld [vmem:[#allocation9 + $0x210] sm:$0xff] }
 0x1a0   :  { %1249 = vmatpush1.bf16.msra.mxu1 %v1248_v30  ;;  %v455_v30 = vld [vmem:[#allocation9 + $0x228] sm:$0xff] }
 0x1a1   :  { %1205 = vmatmul.mubr.msk.f32.vlgmr.msra.gmra.mrb[6].mxu0 %vm217_vm3, %v200_v27  ;;  %v403_v27 = vld [vmem:[#allocation9 + $0x88] sm:$0xff]  ;;  %1251 = vmatprep.subr.bf16.mxu1 %v1250_v34  ;;  %v1274_v34 = vpack.c.bf16 %v462_v32, %v459_v31 }
 0x1a2   :  { %1329 = vmatpush3.bf16.msra.mxu0 %v1328_v8  ;;  %v1336_v33 = vpack.c.bf16 %v403_v27, %v400_v26  ;;  %v1348_v8 = vpack.c.bf16 %v421_v62, %v418_v61  ;;  %v456_v26 = vld [vmem:[#allocation9 + $0x230] sm:$0xff]  ;;  %v1268_v27 = vpack.c.bf16 %v449_v23, %v446_v22  ;;  %v483_v62 = vld [vmem:[#allocation9 + $0x308] sm:$0xff] }
 0x1a3   :  { %1331 = vmatprep.subr.bf16.mxu0 %v1330_v11  ;;  %v1350_v11 = vpack.c.bf16 %v475_v2, %v472_v0  ;;  %v98_v0 = vld [vmem:[%s1792_s6] sm:$0x7]  ;;  %s1535_s6 = smov 20  }
 0x1a4   :  { %1253 = vmatpush1.bf16.msra.mxu1 %v1252_v42  ;;  %v467_v42 = vld [vmem:[#allocation9 + $0x288] sm:$0xff] }
 0x1a5   :  { %1255 = vmatprep.subr.bf16.mxu1 %v1254_v46  ;;  %v1282_v46 = vpack.c.bf16 %v474_v44, %v471_v43  ;;  %v487_v31 = vld [vmem:[#allocation9 + $0x328] sm:$0xff] }
 0x1a6   :  { %1333 = vmatpush3.bf16.msra.mxu0 %v1332_v17  ;;  %v481_v17 = vld [vmem:[#allocation9 + $0x2f8] sm:$0xff] }
 0x1a7   :  { %1335 = vmatprep.subr.bf16.mxu0 %v1334_v25  ;;  %v1354_v24 = vpack.c.bf16 %v481_v17, %v478_v16  ;;  %v453_v25 = vld [vmem:[#allocation9 + $0x218] sm:$0xff] }
 0x1a8   :  { %1257 = vmatpush1.bf16.msra.mxu1 %v1256_v54  ;;  %v1270_v28 = vpack.c.bf16 %v456_v26, %v453_v25  ;;  %v1690_v54 = vshrl.u32 %v202_v53, 7 }
 0x1a9   :  { %1259 = vmatprep.subr.bf16.mxu1 %v1258_v58  ;;  %v1288_v58 = vpack.c.bf16 %v479_v56, %v476_v55  ;;  %v494_v56 = vld [vmem:[#allocation9 + $0x360] sm:$0xff] }
 0x1aa   :  { %1337 = vmatpush3.bf16.msra.mxu0 %v1336_v33  ;;  %v1272_v33 = vpack.c.bf16 %v455_v30, %v452_v29  ;;  %v204_v61 = vsub.s32 0, %v1690_v54  ;;  %v208_v2 = vsub.s32 1, %v1690_v54  ;;  %v212_v13 = vsub.s32 2, %v1690_v54  ;;  %v485_v29 = vld [vmem:[#allocation9 + $0x318] sm:$0xff]  ;;  %v484_v30 = vld [vmem:[#allocation9 + $0x310] sm:$0xff] }
 0x1ab   :  { %1339 = vmatprep.subr.bf16.mxu0 %v1338_v36  ;;  %v461_v36 = vld [vmem:[#allocation9 + $0x258] sm:$0xff] }
 0x1ac   :  { %1261 = vmatpush1.bf16.msra.mxu1 %v1260_v3  ;;  %v1276_v39 = vpack.c.bf16 %v461_v36, %v458_v35  ;;  %v1290_v3 = vpack.c.bf16 %v486_v63, %v483_v62  ;;  %v205_v7 = vrot.slane %v98_v0, %v204_v61  ;;  %v501_v63 = vld [vmem:[#allocation9 + $0x398] sm:$0xff] }
 0x1ad   :  { %1263 = vmatprep.subr.bf16.mxu1 %v1262_v9 }
 0x1ae   :  { %1341 = vmatpush3.bf16.msra.mxu0 %v1340_v45  ;;  %v1280_v45 = vpack.c.bf16 %v467_v42, %v464_v41  ;;  %v549_v41 = vpop.permute.xlu0 %548 }
 0x1af   :  { %1343 = vmatprep.subr.bf16.mxu0 %v1342_v48  ;;  %v473_v48 = vld [vmem:[#allocation9 + $0x2b8] sm:$0xff] }
 0x1b0   :  { %1265 = vmatpush1.bf16.msra.mxu1 %v1264_v18  ;;  %v1284_v51 = vpack.c.bf16 %v473_v48, %v470_v47  ;;  %v493_v47 = vld [vmem:[#allocation9 + $0x358] sm:$0xff]  ;;  %v581_v48 = vsel %vm111_vm1, %v1665_v5, %v549_v41  ;;  %v518_v41 = vld [vmem:[#allocation9 + $0x420] sm:$0xff] }
 0x1b1   :  { %1267 = vmatprep.subr.bf16.mxu1 %v1266_v21  ;;  %v213_v21 = vrot.slane %v98_v0, %v212_v13 }
 0x1b2   :  { %1345 = vmatpush3.bf16.msra.mxu0 %v1344_v57  ;;  %v430_v57 = vld [vmem:[#allocation9 + $0x160] sm:$0xff] }
 0x1b3   :  { %1347 = vmatprep.subr.bf16.mxu0 %v1346_v60  ;;  %v1356_v60 = vpack.c.bf16 %v433_v59, %v430_v57  ;;  %v496_v59 = vld [vmem:[#allocation9 + $0x370] sm:$0xff] }
 0x1b4   :  { %1269 = vmatpush1.bf16.msra.mxu1 %v1268_v27  ;;  %v547_v27 = vpop.permute.xlu1 %546 }
 0x1b5   :  { %1271 = vmatprep.subr.bf16.mxu1 %v1270_v28  ;;  %v482_v28 = vld [vmem:[#allocation9 + $0x300] sm:$0xff]  ;;  %v580_v37 = vsel %vm111_vm1, %v1660_v4, %v547_v27  ;;  %v516_v27 = vld [vmem:[#allocation9 + $0x410] sm:$0xff] }
 0x1b6   :  { %1349 = vmatpush3.bf16.msra.mxu0 %v1348_v8  ;;  %v209_v8 = vrot.slane %v98_v0, %v208_v2  ;;  %v1292_v38 = vpack.c.bf16 %v485_v29, %v482_v28  ;;  %v504_v0 = vld [vmem:[#allocation9 + $0x3b0] sm:$0xff] }
 0x1b7   :  { %1351 = vmatprep.subr.bf16.mxu0 %v1350_v11 }
 0x1b8   :  { %1273 = vmatpush1.bf16.msra.mxu1 %v1272_v33  ;;  %v489_v33 = vld [vmem:[#allocation9 + $0x338] sm:$0xff] }
 0x1b9   :  { %1275 = vmatprep.subr.bf16.mxu1 %v1274_v34  ;;  %v492_v34 = vld [vmem:[#allocation9 + $0x350] sm:$0xff] }
 0x1ba   :  { %1353 = vmatpush3.bf16.msra.mxu0 %v1352_v20  ;;  %v1294_v44 = vpack.c.bf16 %v492_v34, %v489_v33  ;;  %v515_v33 = vld [vmem:[#allocation9 + $0x408] sm:$0xff]  ;;  %v514_v34 = vld [vmem:[#allocation9 + $0x400] sm:$0xff] }
 0x1bb   :  { %1355 = vmatprep.subr.bf16.mxu0 %v1354_v24 }
 0x1bc   :  { %1277 = vmatpush1.bf16.msra.mxu1 %v1276_v39  ;;  %v1359_v39 = vpack.c.bf16 %v487_v31, %v484_v30  ;;  %v512_v30 = vld [vmem:[#allocation9 + $0x3f0] sm:$0xff] }
 0x1bd   :  { %1279 = vmatprep.subr.bf16.mxu1 %v1278_v40  ;;  %v488_v40 = vld [vmem:[#allocation9 + $0x330] sm:$0xff] }
 0x1be   :  { %1357 = vmatpush3.bf16.msra.mxu0 %v1356_v60  ;;  %v499_v60 = vld [vmem:[#allocation9 + $0x388] sm:$0xff] }
 0x1bf   :  { %1358 = vmatprep.subr.bf16.mxu0 %v1534_v6 }
 0x1c0   :  { %1281 = vmatpush1.bf16.msra.mxu1 %v1280_v45  ;;  %v491_v45 = vld [vmem:[#allocation9 + $0x348] sm:$0xff] }
 0x1c1   :  { %1283 = vmatprep.subr.bf16.mxu1 %v1282_v46  ;;  %v490_v46 = vld [vmem:[#allocation9 + $0x340] sm:$0xff]  ;;  %v1296_v53 = vpack.c.bf16 %v491_v45, %v488_v40  ;;  %v523_v45 = vld [vmem:[#allocation9 + $0x448] sm:$0xff] }
 0x1c2   :  { %v1362_v55 = vpack.c.bf16 %v493_v47, %v490_v46  ;;  %v525_v46 = vld [vmem:[#allocation9 + $0x458] sm:$0xff]  ;;  %v528_v47 = vld [vmem:[#allocation9 + $0x470] sm:$0xff] }
 0x1c4   :  { %1285 = vmatpush1.bf16.msra.mxu1 %v1284_v51  ;;  %v495_v51 = vld [vmem:[#allocation9 + $0x368] sm:$0xff] }
 0x1c5   :  { %1287 = vmatprep.subr.bf16.mxu1 %v1286_v52  ;;  %v498_v52 = vld [vmem:[#allocation9 + $0x380] sm:$0xff] }
 0x1c6   :  { %v1298_v62 = vpack.c.bf16 %v498_v52, %v495_v51  ;;  %v524_v51 = vld [vmem:[#allocation9 + $0x450] sm:$0xff]  ;;  %v1318_v52 = vpack.c.bf16 %v528_v47, %v525_v46 }
 0x1c8   :  { %1289 = vmatpush1.bf16.msra.mxu1 %v1288_v58  ;;  %v497_v58 = vld [vmem:[#allocation9 + $0x378] sm:$0xff] }
 0x1c9   :  { %1291 = vmatprep.subr.bf16.mxu1 %v1290_v3 }
 0x26c   :  { %v300_v9 = vpop.f32.mrb[2].mxu0 }
 0x26d   :  { %v301_v10 = vadd.f32 %v300_v9, %v205_v7  ;;  %v302_v11 = vpop.f32.mrb[3].mxu0  ;;  %v500_v9 = vld [vmem:[#allocation9 + $0x390] sm:$0xff] }
 0x26e   :  { %v303_v12 = vadd.f32 %v302_v11, %v209_v8  ;;  %v503_v11 = vld [vmem:[#allocation9 + $0x3a8] sm:$0xff] }
 0x270   :  { %v1409_v14 = vpack.i.bf16 %v303_v12, %v301_v10  ;;  %v306_v16 = vpop.f32.mrb[4].mxu0  ;;  %v1302_v10 = vpack.c.bf16 %v504_v0, %v501_v63  ;;  %v502_v12 = vld [vmem:[#allocation9 + $0x3a0] sm:$0xff]  ;;  %v533_v63 = vld [vmem:[#allocation9 + $0x498] sm:$0xff]  ;;  %v532_v0 = vld [vmem:[#allocation9 + $0x490] sm:$0xff] }
 0x271   :  { %v307_v17 = vadd.f32 %v306_v16, %v205_v7  ;;  %v308_v18 = vpop.f32.mrb[5].mxu0  ;;  %v1300_v7 = vpack.c.bf16 %v497_v58, %v494_v56  ;;  %v507_v16 = vld [vmem:[#allocation9 + $0x3c8] sm:$0xff]  ;;  %v529_v56 = vld [vmem:[#allocation9 + $0x478] sm:$0xff] }
 0x272   :  { %v309_v20 = vadd.f32 %v308_v18, %v209_v8  ;;  %1410 = vrot.lane.b32.xlu1 %v1409_v14, %s1535_s6  ;;  %v1365_v8 = vpack.c.bf16 %v499_v60, %v496_v59  ;;  %v505_v14 = vld [vmem:[#allocation9 + $0x3b8] sm:$0xff]  ;;  %v1304_v18 = vpack.c.bf16 %v503_v11, %v500_v9  ;;  %v530_v60 = vld [vmem:[#allocation9 + $0x480] sm:$0xff]  ;;  %v536_v11 = vld [vmem:[#allocation9 + $0x4b0] sm:$0xf] }
 0x274   :  { %v1414_v22 = vpack.i.bf16 %v309_v20, %v307_v17  ;;  %v1206_v23 = vpop.f32.mrb[6].mxu0  ;;  %v510_v17 = vld [vmem:[#allocation9 + $0x3e0] sm:$0xff]  ;;  %v1368_v20 = vpack.c.bf16 %v505_v14, %v502_v12 }
 0x275   :  { %v377_v24 = vpop.f32.mrb[7].mxu0  ;;  %v383_v26 = vadd.f32 %v1206_v23, %v213_v21  ;;  %v509_v23 = vld [vmem:[#allocation9 + $0x3d8] sm:$0xff]  ;;  %v538_v12 = vld [vmem:[#allocation9 + $0x4c0] sm:$0xf] }
 0x276   :  { %v378_v25 = vadd.f32 %v377_v24, %v213_v21  ;;  %1415 = vrot.lane.b32.xlu1 %v1414_v22, %s1535_s6  ;;  %v506_v21 = vld [vmem:[#allocation9 + $0x3c0] sm:$0xff]  ;;  %v1306_v22 = vpack.c.bf16 %v510_v17, %v507_v16  ;;  %v508_v24 = vld [vmem:[#allocation9 + $0x3d0] sm:$0xff] }
 0x277   :  { %v1308_v28 = vpack.c.bf16 %v509_v23, %v506_v21 }
 0x278   :  { %562 = vrot.lane.b32.xlu0 %v378_v25, %s1535_s6  ;;  %v511_v25 = vld [vmem:[#allocation9 + $0x3e8] sm:$0xff] }
 0x279   :  { %v1371_v29 = vpack.c.bf16 %v511_v25, %v508_v24 }
 0x27a   :  { %568 = vrot.lane.b32.xlu1 %v383_v26, %s1535_s6  ;;  %v513_v26 = vld [vmem:[#allocation9 + $0x3f8] sm:$0xff] }
 0x27b   :  { %v1310_v31 = vpack.c.bf16 %v516_v27, %v513_v26 }
 0x2e4   :  { %v1705_v32 = vpop.permute.xlu1 %1410 }
 0x2e5   :  { %v1413_v35 = vunpack.i.h.bf16 %v1705_v32  ;;  %v1412_v36 = vunpack.i.l.bf16 %v1705_v32 }
 0x2e7   :  { %v570_v42 = vsel %vm217_vm3, %v1412_v36, %v1413_v35  ;;  %v582_v43 = vsel %vm217_vm3, %v580_v37, %v1412_v36  ;;  %v517_v36 = vld [vmem:[#allocation9 + $0x418] sm:$0xff]  ;;  %v519_v37 = vld [vmem:[#allocation9 + $0x428] sm:$0xff] }
 0x2e8   :  { %v1717_v49 = vpop.permute.xlu1 %1415  ;;  %661 = vmatprep.mubr.f32.mxu1 %v570_v42  ;;  %815 = vmatprep.mubr.f32.mxu0 %v570_v42  ;;  %v1374_v40 = vpack.c.bf16 %v517_v36, %v514_v34  ;;  %v539_v34 = vld [vmem:[%s1794_s8] sm:$0x7]  ;;  %s1536_s8 = smov [#allocation10]  }
 0x2e9   :  { %v1418_v4 = vunpack.i.h.bf16 %v1717_v49  ;;  %v1417_v50 = vunpack.i.l.bf16 %v1717_v49  ;;  %662 = vmatmul.mubr.f32.vlgmr.msra.gmra.mrb[0].mxu1 %v582_v43  ;;  %816 = vmatmul.mubr.f32.vlgmr.msra.gmra.mrb[8].mxu0 %v582_v43  ;;  %v521_v43 = vld [vmem:[#allocation9 + $0x438] sm:$0xff]  ;;  %s1105_s12 = sshll.u32 %s1536_s8, 4  ;;  %s1106_s12 = int_to_ptr.vmem [resolvable:$true] %s1105_s12 }
 0x2ea   :  { %1293 = vmatpush1.bf16.msra.mxu1 %v1292_v38  ;;  %1360 = vmatpush1.bf16.msra.mxu0 %v1359_v39  ;;  %v1726_v3 = vpop.permute.xlu0 %562  ;;  %v522_v38 = vld [vmem:[#allocation9 + $0x440] sm:$0xff]  ;;  %v1312_v39 = vpack.c.bf16 %v515_v33, %v512_v30  ;;  %v901_v33 = vstv %s541_s29  ;;  %s1495_s5 = scalar_lea.vmem %s1106_s12, 768  ;;  %p1500_p0 = scmp.lt.s32.totalorder %s1106_s12, %s1106_s12 }
 0x2eb   :  { %v572_v5 = vsel %vm217_vm3, %v1417_v50, %v1418_v4  ;;  %1295 = vmatprep.subr.bf16.mxu1 %v1294_v44  ;;  %1361 = vmatprep.subr.bf16.mxu0 %v1534_v6  ;;  %v583_v57 = vsel %vm217_vm3, %v581_v48, %v1417_v50  ;;  %v1314_v42 = vpack.c.bf16 %v522_v38, %v519_v37  ;;  %v520_v44 = vld [vmem:[#allocation9 + $0x430] sm:$0xff]  ;;  %p1496_p13 = scmp.ne.s32.totalorder %s1106_s12, %s1495_s5  ;;  %p1501_p1 = scmp.lt.s32.totalorder %s1495_s5, %s1495_s5 }
 0x2ec   :  { %667 = vmatprep.mubr.f32.mxu1 %v572_v5  ;;  %820 = vmatprep.mubr.f32.mxu0 %v572_v5  ;;  %v1316_v48 = vpack.c.bf16 %v521_v43, %v518_v41  ;;  %v1377_v50 = vpack.c.bf16 %v523_v45, %v520_v44  ;;  %v531_v5 = vld [vmem:[#allocation9 + $0x488] sm:$0xff]  ;;  %v571_v14 = vsel %vm217_vm3, %v1413_v35, %v1726_v3  ;;  %v569_v16 = vpop.permute.xlu1 %568 }
 0x2ed   :  { %668 = vmatmul.mubr.f32.gmra.mrb[2].mxu1 %v583_v57  ;;  %821 = vmatmul.mubr.f32.gmra.mrb[10].mxu0 %v583_v57  ;;  %v534_v57 = vld [vmem:[#allocation9 + $0x4a0] sm:$0xff]  ;;  %p1502_p2 = por %p1501_p1, %p1500_p0 }
 0x2ee   :  { %1297 = vmatpush1.bf16.msra.mxu1 %v1296_v53  ;;  %1363 = vmatpush1.bf16.msra.mxu0 %v1362_v55  ;;  %v527_v53 = vld [vmem:[#allocation9 + $0x468] sm:$0xff]  ;;  %v526_v55 = vld [vmem:[#allocation9 + $0x460] sm:$0xff] }
 0x2ef   :  { %1131 = vmatprep.mubr.msk.f32.mxu1 %vm217_vm3, %v1726_v3  ;;  %1134 = vmatprep.mubr.msk.f32.mxu0 %vm217_vm3, %v1726_v3  ;;  %v1320_v58 = vpack.c.bf16 %v527_v53, %v524_v51  ;;  %v1380_v59 = vpack.c.bf16 %v529_v56, %v526_v55  ;;  %v1078_v53 = vrot.slane %v539_v34, %v212_v13  ;;  %p1503_p3 = pnand %p1502_p2, %p1496_p13 }
 0x2f0   :  { %1299 = vmatprep.subr.bf16.mxu1 %v1298_v62  ;;  %1364 = vmatprep.subr.bf16.mxu0 %v1534_v6  ;;  %v1322_v62 = vpack.c.bf16 %v534_v57, %v531_v5 }
 0x2f2   :  { %1301 = vmatpush1.bf16.msra.mxu1 %v1300_v7  ;;  %1366 = vmatpush1.bf16.msra.mxu0 %v1365_v8  ;;  %v535_v7 = vld [vmem:[#allocation9 + $0x4a8] sm:$0xff]  ;;  %v1324_v8 = vpack.c.bf16 %v533_v63, %v530_v60 }
 0x2f3   :  { %1303 = vmatprep.subr.bf16.mxu1 %v1302_v10  ;;  %1367 = vmatprep.subr.bf16.mxu0 %v1534_v6  ;;  %v1383_v9 = vpack.c.bf16 %v535_v7, %v532_v0  ;;  %v537_v10 = vld [vmem:[#allocation9 + $0x4b8] sm:$0xf] }
 0x2f6   :  { %1305 = vmatpush1.bf16.msra.mxu1 %v1304_v18  ;;  %1369 = vmatpush1.bf16.msra.mxu0 %v1368_v20 }
 0x2f7   :  { %1307 = vmatprep.subr.bf16.mxu1 %v1306_v22  ;;  %1370 = vmatprep.subr.bf16.mxu0 %v1534_v6 }
 0x2fa   :  { %1309 = vmatpush1.bf16.msra.mxu1 %v1308_v28  ;;  %1372 = vmatpush1.bf16.msra.mxu0 %v1371_v29 }
 0x2fb   :  { %1311 = vmatprep.subr.bf16.mxu1 %v1310_v31  ;;  %1373 = vmatprep.subr.bf16.mxu0 %v1534_v6 }
 0x2fe   :  { %1313 = vmatpush1.bf16.msra.mxu1 %v1312_v39  ;;  %1375 = vmatpush1.bf16.msra.mxu0 %v1374_v40  ;;  %v1074_v39 = vrot.slane %v539_v34, %v208_v2 }
 0x2ff   :  { %1315 = vmatprep.subr.bf16.mxu1 %v1314_v42  ;;  %1376 = vmatprep.subr.bf16.mxu0 %v1534_v6 }
 0x302   :  { %1317 = vmatpush1.bf16.msra.mxu1 %v1316_v48  ;;  %1378 = vmatpush1.bf16.msra.mxu0 %v1377_v50 }
 0x303   :  { %1319 = vmatprep.subr.bf16.mxu1 %v1318_v52  ;;  %1379 = vmatprep.subr.bf16.mxu0 %v1534_v6 }
 0x306   :  { %1321 = vmatpush1.bf16.msra.mxu1 %v1320_v58  ;;  %1381 = vmatpush1.bf16.msra.mxu0 %v1380_v59 }
 0x307   :  { %1323 = vmatprep.subr.bf16.mxu1 %v1322_v62  ;;  %1382 = vmatprep.subr.bf16.mxu0 %v1534_v6  ;;  %v573_v6 = vsel %vm217_vm3, %v1418_v4, %v569_v16 }
 0x30a   :  { %1325 = vmatpush1.bf16.msra.mxu1 %v1324_v8  ;;  %1384 = vmatpush1.bf16.msra.mxu0 %v1383_v9 }
 0x30b   :  { %1129 = vmatprep.subr.msk.mxu1 %vm224_vm2, %v537_v10  ;;  %862 = vmatprep.subr.mxu0 %v1533_v19 }
 0x30e   :  { %1130 = vmatpush1.msk.msra.mxu1 %vm224_vm2, %v536_v11  ;;  %1133 = vmatpush1.msk.msra.mxu0 %vm224_vm2, %v538_v12 }
 0x30f   :  { %739 = vmatmul.mubr.f32.vlgmr.msra.gmra.mrb[0].mxu1 %v571_v14  ;;  %891 = vmatmul.mubr.f32.vlgmr.msra.gmra.mrb[12].mxu0 %v571_v14 }
 0x310   :  { %1132 = vmatprep.mubr.msk.f32.mxu1 %vm217_vm3, %v569_v16  ;;  %1135 = vmatprep.mubr.msk.f32.mxu0 %vm217_vm3, %v569_v16 }
 0x313   :  { %745 = vmatmul.mubr.f32.gmra.mrb[2].mxu1 %v573_v6  ;;  %896 = vmatmul.mubr.f32.gmra.mrb[14].mxu0 %v573_v6 }
 0x314   :  { %972 = vmatprep.mubr.f32.mxu0 %v1533_v19 }
 0x3bc   :  { %v1181_v32 = vpop.f32.mrb[8].mxu0 }
 0x3bd   :  { %v1182_v35 = vpop.f32.mrb[9].mxu0 }
 0x3be   :  { %v1183_v3 = vadd.f32 %v1182_v35, %v1181_v32 }
 0x3c0   :  { %v1184_v17 = vpop.f32.mrb[10].mxu0 }
 0x3c1   :  { %v1185_v18 = vpop.f32.mrb[11].mxu0 }
 0x3c2   :  { %v1186_v20 = vadd.f32 %v1185_v18, %v1184_v17 }
 0x3e2   :  { %v740_v21 = vpop.f32.mrb[0].mxu1  ;;  %v892_v22 = vpop.f32.mrb[12].mxu0 }
 0x3e3   :  { %v893_v23 = vadd.f32 %v1183_v3, %v892_v22  ;;  %v742_v24 = vpop.f32.mrb[1].mxu1  ;;  %v894_v25 = vpop.f32.mrb[13].mxu0  ;;  %v902_v36 = vmul.f32 %v901_v33, %v740_v21 }
 0x3e4   :  { %v903_v37 = vmul.f32 %v901_v33, %v742_v24 }
 0x3e5   :  { %v904_v56 = vmul.f32 %v901_v33, %v893_v23 }
 0x3e6   :  { %v746_v26 = vpop.f32.mrb[2].mxu1  ;;  %v897_v27 = vpop.f32.mrb[14].mxu0 }
 0x3e7   :  { %v1387_v49 = vpack.c.bf16 %v746_v26, %v740_v21  ;;  %v898_v28 = vadd.f32 %v1186_v20, %v897_v27  ;;  %v748_v4 = vpop.f32.mrb[3].mxu1  ;;  %v899_v29 = vpop.f32.mrb[15].mxu0 }
 0x3e8   :  { %v1385_v30 = vpack.c.bf16 %v748_v4, %v742_v24  ;;  %v906_v43 = vmul.f32 %v901_v33, %v748_v4 }
 0x3e9   :  { %v1389_v31 = vpack.c.bf16 %v898_v28, %v893_v23  ;;  %v907_v52 = vmul.f32 %v901_v33, %v898_v28 }
 0x3ea   :  { %1386 = vmatprep.subr.bf16.mxu0 %v1385_v30 }
 0x3eb   :  { %1388 = vmatpush1.bf16.msra.mxu0 %v1387_v49 }
 0x3ec   :  { %1390 = vmatprep.subr.bf16.mxu0 %v1389_v31 }
 0x3ee   :  { %1136 = vmatmul.mubr.msk.f32.vlgmr.msra.gmra.mrb[16].mxu0 %vm117_vm0, %v1649_v1 }
 0x3ef   :  { %1392 = vmatpush3.bf16.msra.mxu0 %v1389_v31  ;;  %978 = vmatprep.mubr.f32.mxu0 %v1533_v19  ;;  %v1070_v19 = vrot.slane %v539_v34, %v204_v61 }
 0x3f2   :  { %1137 = vmatmul.mubr.msk.f32.gmra.mrb[18].mxu0 %vm117_vm0, %v1674_v15 }
 0x3f3   :  { %1211 = vmatprep.mubr.msk.f32.mxu0 %vm117_vm0, %v1649_v1 }
 0x3f6   :  { %1212 = vmatmul.mubr.msk.f32.vlgmr.msra.gmra.mrb[20].mxu0 %vm117_vm0, %v1674_v15  ;;  %v905_v15 = vmul.f32 %v901_v33, %v746_v26 }
 0x4c1   :  { %v974_v38 = vpop.f32.mrb[16].mxu0 }
 0x4c2   :  { %v1060_v1 = vadd.f32 %v974_v38, %v902_v36  ;;  %v976_v40 = vpop.f32.mrb[17].mxu0 }
 0x4c3   :  { %v1061_v41 = vadd.f32 %v976_v40, %v903_v37 }
 0x4c4   :  { %v1082_v42 = vadd.f32 %v1070_v19, %v1060_v1 }
 0x4c5   :  { %v1083_v44 = vadd.f32 %v1074_v39, %v1061_v41  ;;  %v980_v45 = vpop.f32.mrb[18].mxu0 }
 0x4c6   :  { %v1088_v46 = vmax.f32 %v1082_v42, 0.0  ;;  %v1063_v47 = vadd.f32 %v980_v45, %v905_v15  ;;  %v982_v48 = vpop.f32.mrb[19].mxu0 }
 0x4c7   :  { %v1089_v50 = vmax.f32 %v1083_v44, 0.0  ;;  %v1064_v51 = vadd.f32 %v982_v48, %v906_v43 }
 0x4c8   :  { %1094 = vst [vmem:[#allocation10] sm:$0xff] %v1088_v46  ;;  %v1085_v61 = vadd.f32 %v1070_v19, %v1063_v47 }
 0x4c9   :  { %1095 = vst [vmem:[#allocation10 + $0x8] sm:$0xff] %v1089_v50  ;;  %v1086_v2 = vadd.f32 %v1074_v39, %v1064_v51  ;;  %v1213_v55 = vpop.f32.mrb[20].mxu0 }
 0x4ca   :  { %v1091_v5 = vmax.f32 %v1085_v61, 0.0  ;;  %v1065_v57 = vadd.f32 %v1213_v55, %v907_v52  ;;  %v1051_v58 = vpop.f32.mrb[21].mxu0 }
 0x4cb   :  { %v1092_v59 = vmax.f32 %v1086_v2, 0.0  ;;  %v1062_v60 = vadd.f32 %v1051_v58, %v904_v56 }
 0x4cc   :  { %1097 = vst [vmem:[#allocation10 + $0x18] sm:$0xff] %v1091_v5  ;;  %v1087_v62 = vadd.f32 %v1078_v53, %v1065_v57 }
 0x4cd   :  { %1098 = vst [vmem:[#allocation10 + $0x20] sm:$0xff] %v1092_v59  ;;  %v1084_v63 = vadd.f32 %v1078_v53, %v1062_v60 }
 0x4ce   :  { %v1093_v0 = vmax.f32 %v1087_v62, 0.0 }
 0x4cf   :  { %v1090_v7 = vmax.f32 %v1084_v63, 0.0 }
 0x4d0   :  { %1099 = vst [vmem:[#allocation10 + $0x28] sm:$0xff] %v1093_v0 }
 0x4d1   :  { %1096 = vst [vmem:[#allocation10 + $0x10] sm:$0xff] %v1090_v7 }
 0x4d2   :  { %1506 = shalt.err (!%p1503_p3)
}
 0x4d3   :  { %s1507_s4 = scalar_lea.hbm %s1795_s9, 768 }
 0x4d4   :  { %p1508_p4 = scmp.ne.s32.totalorder %s1795_s9, %s1507_s4  ;;  %p1511_p5 = scmp.lt.u32.totalorder %s1507_s4, %s1795_s9 }
 0x4d6   :  { %p1513_p6 = pnand %p1511_p5, %p1508_p4 }
 0x4d8   :  { %1516 = shalt.err (!%p1513_p6)
}
 0x4d9   :  { %1111 = dma.vmem_to_hbm [thread:$0]  %s1106_s12, 768, %s1795_s9, [#allocation4], %s1526_s19, %s1526_s19, %s1527_s20  }
 0x4da   :  { %1523 = dma.done.wait [#allocation4], 768  }
 0x4db   :  { %1524 = vsyncadd [#allocation4], 4294966528 }
 0x4dc   :  { %1115 = vsyncpa [#allocation3], 1 }
 0x4dd   :  { %1116 = vsyncpa [#allocation8], 1 }
 0x4de   :  { %1117 = vsyncpa [#allocation4], 1 }
 0x4df   :  { %1118 = vsyncpa [#allocation5], 1 }

</bundles_post_ra>
